<compile_context>
chip_gen: v6e
topology: v6e:2x2x1
jax: 0.10.0
libtpu: 0.0.40
codegen_flags: <defaults>
</compile_context>

<pallas_src>
import jax
import jax.numpy as jnp
from jax.experimental import pallas as pl
from jax.experimental.pallas import tpu as pltpu


def _softmax_lanes(v, approx_recip):
    # numerically-stable softmax over the last (lane) axis
    m = jnp.max(v, axis=-1, keepdims=True)
    e = jnp.exp(v - m)
    s = jnp.sum(e, axis=-1, keepdims=True)
    # approx=True lowers to the (co-issued) EUP vrcp but is only ~2^-12
    # accurate; default stays exact to preserve the 1e-5 tolerance.
    return e * pl.reciprocal(s, approx=approx_recip)


def _make_kernel(eta, optimistic, approx_recip):
    neg_eta = -float(eta)
    la_scale = neg_eta * (2.0 if optimistic else 1.0)  # fold the optimistic x2

    def kernel(x_ref, ar_ref, m_ref, out_ref):
        x = x_ref[...].astype(jnp.float32)        # (1, K)
        ar = ar_ref[...].astype(jnp.float32)      # (1, K)
        m = m_ref[...].astype(jnp.float32)        # (K, 2K) == [Cq.T | Cp]
        k = x.shape[-1]

        a = _softmax_lanes(ar, approx_recip)      # (1, K)

        # Single MXU pass, lane-dense (1, 2K) result; both "matvecs" are done
        # here, before the second softmax, so nothing heavy follows it.
        r = jnp.dot(a, m, preferred_element_type=jnp.float32)
        la = r[:, :k]                             # (1, K) == (Cq @ a).T
        pre = r[:, k:]                            # (1, K) == (a.T @ Cp)

        qta = _softmax_lanes(neg_eta * x + la_scale * la, approx_recip)

        # mean(a.T @ Cp @ Qta) of a (1,1) matrix == sum(pre * qta)
        out_ref[...] = jnp.sum(pre * qta, axis=-1, keepdims=True)  # (1, 1)

    return kernel


def deviate_loss(x, ar, cp, cq, *, eta, optimistic=False, approx_recip=False):
    """Pallas forward pass of the PyTorch Model. Returns a scalar f32."""
    K = x.shape[0]
    x_row = jnp.reshape(x, (1, K))
    ar_row = jnp.reshape(ar, (1, K))
    # Combined matrix so both matvecs happen in one matmul right after the
    # first softmax.
    m = jnp.concatenate([cq.T, cp], axis=1)       # (K, 2K)

    # Raise the scoped-VMEM limit only when the single-block layout needs it
    # (default scoped limit is 16-32 MiB, well below physical VMEM).
    compiler_params = None
    vmem_bytes = 2 * m.dtype.itemsize * m.size + 64 * K  # rough, w/ headroom
    if vmem_bytes > (16 << 20):
        compiler_params = pltpu.CompilerParams(
            vmem_limit_bytes=min(vmem_bytes + (4 << 20), 100 << 20))
    # TODO(synk): for very large K (single block exceeding ~60 MiB on v7x),
    # switch to a row-tiled grid over K accumulating the (1, 2K) partial r.

    out = pl.pallas_call(
        _make_kernel(float(eta), bool(optimistic), bool(approx_recip)),
        out_shape=jax.ShapeDtypeStruct((1, 1), jnp.float32),
        in_specs=[
            pl.BlockSpec(memory_space=pltpu.MemorySpace.VMEM),
            pl.BlockSpec(memory_space=pltpu.MemorySpace.VMEM),
            pl.BlockSpec(memory_space=pltpu.MemorySpace.VMEM),
        ],
        out_specs=pl.BlockSpec(memory_space=pltpu.MemorySpace.VMEM),
        compiler_params=compiler_params,
    )(x_row, ar_row, m)
    return out[0, 0]


def _reference(x, ar, cp, cq, *, eta, optimistic=False):
    # pure-JAX reference mirroring the PyTorch module
    a = jax.nn.softmax(ar, axis=0)
    la = cp * 0.0 @ a * 0.0 + cq @ a  # keep it simple: la = cq @ a
    la = cq @ a
    if optimistic:
        la = la * 2.0
    qta = jax.nn.softmax(-eta * (x + la), axis=0)
    dlv = cp @ qta
    return jnp.mean(a.T @ dlv)


if __name__ == "__main__":
    K = 8
    eta = 0.5

    key = jax.random.PRNGKey(0)
    k_ar, k_cp, k_cq, k_x = jax.random.split(key, 4)

    # det=False branch of the module: ar ~ randn(K, 1); Cp, Cq are (K, K).
    ar = jax.random.normal(k_ar, (K, 1), dtype=jnp.float32)
    Cp = jax.random.normal(k_cp, (K, K), dtype=jnp.float32)
    Cq = jax.random.normal(k_cq, (K, K), dtype=jnp.float32)
    x = jax.random.normal(k_x, (K, 1), dtype=jnp.float32)

    for optimistic in (False, True):
        out = deviate_loss(x, ar, Cp, Cq, eta=eta, optimistic=optimistic)
        out = jax.block_until_ready(out)
        ref = _reference(x, ar, Cp, Cq, eta=eta, optimistic=optimistic)
        assert jnp.allclose(out, ref, atol=1e-5, rtol=1e-5), (optimistic, out, ref)

    print("KERNEL_OK")
</pallas_src>

<mosaic_0001>
module attributes {stable_mosaic.version = 11 : i64} {
  func.func @kernel(%arg0: memref<1x8xf32, #tpu.memory_space<vmem>>, %arg1: memref<1x8xf32, #tpu.memory_space<vmem>>, %arg2: memref<8x16xf32, #tpu.memory_space<vmem>>, %arg3: memref<1x1xf32, #tpu.memory_space<vmem>>) attributes {dimension_semantics = [], scalar_prefetch = 0 : i64, scratch_operands = 0 : i64, tpu.core_type = #tpu.core_type<tc>} {
    %c0 = arith.constant 0 : index
    %c0_0 = arith.constant 0 : index
    %0 = vector.load %arg0[%c0, %c0_0] : memref<1x8xf32, #tpu.memory_space<vmem>>, vector<1x8xf32>
    %c0_1 = arith.constant 0 : index
    %c0_2 = arith.constant 0 : index
    %1 = vector.load %arg1[%c0_1, %c0_2] : memref<1x8xf32, #tpu.memory_space<vmem>>, vector<1x8xf32>
    %c0_3 = arith.constant 0 : index
    %c0_4 = arith.constant 0 : index
    %2 = vector.load %arg2[%c0_3, %c0_4] : memref<8x16xf32, #tpu.memory_space<vmem>>, vector<8x16xf32>
    %cst = arith.constant dense<0xFF800000> : vector<1xf32>
    %3 = vector.multi_reduction <maximumf>, %1, %cst [1] : vector<1x8xf32> to vector<1xf32>
    %4 = vector.shape_cast %3 : vector<1xf32> to vector<1x1xf32>
    %5 = vector.broadcast %4 : vector<1x1xf32> to vector<1x8xf32>
    %6 = arith.subf %1, %5 : vector<1x8xf32>
    %7 = math.exp %6 : vector<1x8xf32>
    %cst_5 = arith.constant dense<0.000000e+00> : vector<1xf32>
    %8 = vector.multi_reduction <add>, %7, %cst_5 [1] : vector<1x8xf32> to vector<1xf32>
    %9 = vector.shape_cast %8 : vector<1xf32> to vector<1x1xf32>
    %10 = tpu.reciprocal %9 : vector<1x1xf32> -> vector<1x1xf32>
    %11 = vector.broadcast %10 : vector<1x1xf32> to vector<1x8xf32>
    %12 = arith.mulf %7, %11 : vector<1x8xf32>
    %cst_6 = arith.constant dense<0.000000e+00> : vector<1x16xf32>
    %13 = tpu.matmul %12, %2, %cst_6 {dimension_numbers = #tpu.dot_dimension_numbers<[1], [0], [0], [1], [0, 0, 1, 1], [], []>} : vector<1x8xf32>, vector<8x16xf32>, vector<1x16xf32> -> vector<1x16xf32>
    %14 = vector.extract_strided_slice %13 {offsets = [0, 0], sizes = [1, 8], strides = [1, 1]} : vector<1x16xf32> to vector<1x8xf32>
    %15 = vector.extract_strided_slice %13 {offsets = [0, 8], sizes = [1, 8], strides = [1, 1]} : vector<1x16xf32> to vector<1x8xf32>
    %cst_7 = arith.constant -5.000000e-01 : f32
    %16 = vector.broadcast %cst_7 : f32 to vector<1x8xf32>
    %17 = arith.mulf %16, %0 : vector<1x8xf32>
    %cst_8 = arith.constant -5.000000e-01 : f32
    %18 = vector.broadcast %cst_8 : f32 to vector<1x8xf32>
    %19 = arith.mulf %18, %14 : vector<1x8xf32>
    %20 = arith.addf %17, %19 : vector<1x8xf32>
    %cst_9 = arith.constant dense<0xFF800000> : vector<1xf32>
    %21 = vector.multi_reduction <maximumf>, %20, %cst_9 [1] : vector<1x8xf32> to vector<1xf32>
    %22 = vector.shape_cast %21 : vector<1xf32> to vector<1x1xf32>
    %23 = vector.broadcast %22 : vector<1x1xf32> to vector<1x8xf32>
    %24 = arith.subf %20, %23 : vector<1x8xf32>
    %25 = math.exp %24 : vector<1x8xf32>
    %cst_10 = arith.constant dense<0.000000e+00> : vector<1xf32>
    %26 = vector.multi_reduction <add>, %25, %cst_10 [1] : vector<1x8xf32> to vector<1xf32>
    %27 = vector.shape_cast %26 : vector<1xf32> to vector<1x1xf32>
    %28 = tpu.reciprocal %27 : vector<1x1xf32> -> vector<1x1xf32>
    %29 = vector.broadcast %28 : vector<1x1xf32> to vector<1x8xf32>
    %30 = arith.mulf %25, %29 : vector<1x8xf32>
    %31 = arith.mulf %15, %30 : vector<1x8xf32>
    %cst_11 = arith.constant dense<0.000000e+00> : vector<1xf32>
    %32 = vector.multi_reduction <add>, %31, %cst_11 [1] : vector<1x8xf32> to vector<1xf32>
    %33 = vector.shape_cast %32 : vector<1xf32> to vector<1x1xf32>
    %c0_12 = arith.constant 0 : index
    %c0_13 = arith.constant 0 : index
    %34 = vector.load %arg3[%c0_12, %c0_13] : memref<1x1xf32, #tpu.memory_space<vmem>>, vector<1x1xf32>
    tpu.vector_store %arg3[%c0_12, %c0_13], %33 {strides = array<i32>} : memref<1x1xf32, #tpu.memory_space<vmem>>, vector<1x1xf32>,
    return
  }
}

</mosaic_0001>

<bundles_post_ra>
// kernel: tpu_custom_call.1
= control target key start
LH: loop header
LB: loop body
LE: loop exit
PB: predicated region body
PF: predicated region fallthrough
CT: control target
= control target key end

     0   :  { %8 = vsyncpa [#allocation3], 0  ;;  %s309_s0 = inlined_call_operand.hbm [shape: f32[1,8], index: 0, kind: input, shape index: {}]   ;;  %s310_s1 = inlined_call_operand.vmem [shape: f32[1,8], index: 1, kind: input, shape index: {}]   ;;  %s311_s2 = inlined_call_operand.hbm [shape: f32[8,16], index: 2, kind: input, shape index: {}]   ;;  %s312_s3 = inlined_call_operand.hbm [shape: f32[1,1], index: 3, kind: output, shape index: {}]  }
   0x1   :  { %9 = vsyncpa [#allocation6], 0 }
   0x2   :  { %10 = vsyncpa [#allocation4], 0  ;;  %s265_s12 = smov [#allocation2]   ;;  %s266_s14 = smov [#allocation5]  }
   0x3   :  { %s17_s13 = sshll.u32 %s265_s12, 4  ;;  %s29_s15 = sshll.u32 %s266_s14, 4  ;;  %s18_s13 = int_to_ptr.vmem [resolvable:$true] %s17_s13  ;;  %s30_s15 = int_to_ptr.vmem [resolvable:$true] %s29_s15 }
   0x4   :  { %s207_s16 = scalar_lea.vmem %s18_s13, 16  ;;  %s211_s17 = scalar_lea.vmem %s18_s13, 32 }
   0x5   :  { %p208_p0 = scmp.ne.s32.totalorder %s18_s13, %s207_s16  ;;  %p212_p1 = scmp.lt.s32.totalorder %s18_s13, %s18_s13 }
   0x6   :  { %p213_p2 = scmp.lt.s32.totalorder %s211_s17, %s207_s16 }
   0x8   :  { %p214_p3 = por %p213_p2, %p212_p1 }
   0xa   :  { %p215_p4 = pnand %p214_p3, %p208_p0 }
   0xc   :  { %218 = shalt.err (!%p215_p4)
}
   0xd   :  { %20 = dma.hbm_to_vmem [thread:$0]  %s309_s0, 16, %s18_s13, [#allocation3]  }
   0xe   :  { %s227_s20 = scalar_lea.vmem %s30_s15, 128  ;;  %p232_p6 = scmp.lt.s32.totalorder %s30_s15, %s30_s15 }
   0xf   :  { %p228_p5 = scmp.ne.s32.totalorder %s30_s15, %s227_s20  ;;  %p233_p7 = scmp.lt.s32.totalorder %s227_s20, %s227_s20 }
  0x11   :  { %p234_p8 = por %p233_p7, %p232_p6 }
  0x13   :  { %p235_p9 = pnand %p234_p8, %p228_p5 }
  0x15   :  { %238 = shalt.err (!%p235_p9)
}
  0x16   :  { %32 = dma.hbm_to_vmem [thread:$0]  %s311_s2, 128, %s30_s15, [#allocation6]  }
  0x17   :  { %259 = dma.done.wait [#allocation3], 16  }
  0x18   :  { %260 = vsyncadd [#allocation3], 4294967280 }
  0x19   :  { %261 = dma.done.wait [#allocation6], 128  }
  0x1a   :  { %262 = vsyncadd [#allocation6], 4294967168  ;;  %vm42_vm0 = vcmask 57344   ;;  %v40_v0 = vld [vmem:[%s310_s1] sm:$0x1]  ;;  %v41_v7 = vld [vmem:[#allocation5] sm:$0xff]  ;;  %v143_v25 = vlaneseq }
  0x1b   :  { %v43_v1 = vsel %vm42_vm0, %v40_v0, -inf  ;;  %v267_v8 = vmov 0.0   ;;  %vm268_vm1 = vmmov 0   ;;  %vm54_vm2 = vcmask 64512   ;;  %v39_v12 = vld [vmem:[#allocation2] sm:$0x1] }
  0x1c   :  { %44 = vmax.xlane.f32.xlu0 %v43_v1  ;;  %179 = vmatprep.subr.mxu0 %v267_v8  ;;  %v128_v13 = vmul.f32 -0.5, %v39_v12  ;;  %v144_v26 = vshrl.u32 %v143_v25, 7  ;;  %s269_s0 = smov 8   ;;  %s270_s1 = smov 120   ;;  %vm158_vm3 = vcmask 0  }
  0x1d   :  { %181 = vmatprep.mubr.msk.f32.mxu0 %vm268_vm1, %v267_v8  ;;  %180 = vmatpush3.msra.mxu0 %v41_v7  ;;  %s271_s2 = smov [#allocation7]  }
  0x1e   :  { %v145_v27 = vsub.s32 0, %v144_v26  ;;  %s166_s25 = sshll.u32 %s271_s2, 4  ;;  %s167_s25 = int_to_ptr.vmem [resolvable:$true] %s166_s25 }
  0x1f   :  { %s239_s26 = scalar_lea.vmem %s167_s25, 16  ;;  %s243_s27 = scalar_lea.vmem %s167_s25, 32 }
  0x20   :  { %p240_p10 = scmp.ne.s32.totalorder %s167_s25, %s239_s26  ;;  %p244_p11 = scmp.lt.s32.totalorder %s167_s25, %s167_s25 }
  0x21   :  { %p245_p12 = scmp.lt.s32.totalorder %s243_s27, %s239_s26 }
  0x23   :  { %p246_p13 = por %p245_p12, %p244_p11 }
  0x25   :  { %p247_p0 = pnand %p246_p13, %p240_p10 }
  0xa5   :  { %v45_v2 = vpop.xlane.xlu0 %44 }
  0xa6   :  { %v46_v3 = vsub.f32 %v40_v0, %v45_v2 }
  0xa8   :  { %v47_v4 = vmul.f32 1.442695, %v46_v3 }
  0xaa   :  { %191 = vpow2.f32 %v47_v4 }
  0xb7   :  { %v192_v5 = vpop.eup %191 }
  0xb8   :  { %v49_v6 = vsel %vm42_vm0, %v192_v5, 0.0 }
  0xb9   :  { %50 = vadd.xlane.f32.xlu0 %v49_v6 }
 0x142   :  { %v51_v9 = vpop.xlane.xlu0 %50 }
 0x143   :  { %193 = vrcp.f32 %v51_v9 }
 0x150   :  { %v194_v10 = vpop.eup %193 }
 0x151   :  { %v53_v11 = vmul.f32 %v194_v10, %v192_v5 }
 0x153   :  { %182 = vmatmul.mubr.msk.f32.vlgmr.msra.gmra.mxu0 %vm54_vm2, %v53_v11 }
 0x213   :  { %v124_v14 = vpop.f32.mrf.mxu0 }
 0x214   :  { %v129_v15 = vmul.f32 -0.5, %v124_v14 }
 0x215   :  { %v183_v16 = vpop.f32.mrf.mxu0 }
 0x216   :  { %v130_v17 = vadd.f32 %v129_v15, %v128_v13 }
 0x218   :  { %v131_v18 = vsel %vm42_vm0, %v130_v17, -inf }
 0x219   :  { %132 = vmax.xlane.f32.xlu1 %v131_v18 }
 0x2a2   :  { %v133_v19 = vpop.xlane.xlu1 %132 }
 0x2a3   :  { %v134_v20 = vsub.f32 %v130_v17, %v133_v19 }
 0x2a5   :  { %v135_v21 = vmul.f32 1.442695, %v134_v20 }
 0x2a7   :  { %195 = vpow2.f32 %v135_v21 }
 0x2b4   :  { %v196_v22 = vpop.eup %195 }
 0x2b5   :  { %v137_v23 = vsel %vm42_vm0, %v196_v22, 0.0 }
 0x2b6   :  { %138 = vadd.xlane.f32.xlu1 %v137_v23 }
 0x33f   :  { %v139_v24 = vpop.xlane.xlu1 %138 }
 0x340   :  { %197 = vrcp.f32 %v139_v24 }
 0x34d   :  { %v198_v28 = vpop.eup %197 }
 0x34e   :  { %v141_v29 = vmul.f32 %v198_v28, %v196_v22 }
 0x350   :  { %v146_v30 = vrot.slane %v141_v29, %v145_v27 }
 0x352   :  { %147 = vrot.lane.b32.xlu0 %v146_v30, %s269_s0 }
 0x3c4   :  { %v148_v31 = vpop.permute.xlu0 %147 }
 0x3c5   :  { %v150_v32 = vmul.f32 %v148_v31, %v124_v14 }
 0x3c7   :  { %152 = vrot.lane.b32.xlu1 %v150_v32, %s270_s1 }
 0x439   :  { %v153_v33 = vpop.permute.xlu1 %152 }
 0x43a   :  { %v155_v34 = vsel %vm42_vm0, %v153_v33, 0.0 }
 0x43b   :  { %156 = vadd.xlane.f32.xlu1 %v155_v34 }
 0x4c4   :  { %v157_v35 = vpop.xlane.xlu1 %156 }
 0x4c5   :  { %159 = vst.msk [vmem:[#allocation7] sm:$0x1] %vm158_vm3, %v157_v35 }
 0x4c6   :  { %250 = shalt.err (!%p247_p0)
}
 0x4c7   :  { %169 = dma.vmem_to_hbm [thread:$0]  %s167_s25, 16, %s312_s3, [#allocation4]  }
 0x4c8   :  { %263 = dma.done.wait [#allocation4], 16  }
 0x4c9   :  { %264 = vsyncadd [#allocation4], 4294967280 }
 0x4ca   :  { %173 = vsyncpa [#allocation3], 1 }
 0x4cb   :  { %174 = vsyncpa [#allocation6], 1 }
 0x4cc   :  { %175 = vsyncpa [#allocation4], 1 }

</bundles_post_ra>
